<compile_context>
chip_gen: v7x
topology: tpu7x:2x2x1
jax: 0.10.0
libtpu: 0.0.40
codegen_flags: <defaults>
</compile_context>

<pallas_src>
import math
import functools

import jax
import jax.numpy as jnp
from jax.experimental import pallas as pl
from jax.experimental.pallas import tpu as pltpu


def mha_kernel(x_ref, bias_ref, wqkv_ref, bqkv_ref, wo_ref, bo_ref, o_ref, *,
               n_heads, approx_recip):
    """One grid step handles a block of B_TILE batch rows end-to-end:
       fused QKV projection -> per-head scores -> additive mask -> softmax ->
       context -> output projection."""
    bt, qlen, dim = x_ref.shape
    dph = dim // n_heads
    cdt = x_ref.dtype                      # compute dtype for MXU inputs (f32 or bf16)

    # Fold (B_TILE, qlen) into the matmul M dimension.
    x2 = x_ref[...].reshape(bt * qlen, dim)

    # Fused QKV projection: one MXU pass with a lane-dense N = 3*dim output.
    # (Q weights/bias are pre-scaled by 1/sqrt(dph) in the wrapper.)
    qkv = (jnp.dot(x2, wqkv_ref[...], preferred_element_type=jnp.float32)
           + bqkv_ref[...].astype(jnp.float32))           # (bt*qlen, 3*dim) f32

    bias = bias_ref[...][:, None, :]                      # (bt, 1, klen) f32 additive

    ctx_heads = []
    # Static unroll over heads: only one head's (bt, qlen, klen) slab is live.
    for h in range(n_heads):
        lo = h * dph
        q_h = qkv[:, lo:lo + dph].reshape(bt, qlen, dph).astype(cdt)
        k_h = qkv[:, dim + lo:dim + lo + dph].reshape(bt, qlen, dph).astype(cdt)
        v_h = qkv[:, 2 * dim + lo:2 * dim + lo + dph].reshape(bt, qlen, dph).astype(cdt)

        # scores: (bt, qlen, klen), f32 accumulation on the MXU.
        s = jnp.einsum('bqd,bkd->bqk', q_h, k_h,
                       preferred_element_type=jnp.float32) + bias

        # Softmax over keys, all math in f32 (v5e VPU/EUP have no bf16 path).
        m = jnp.max(s, axis=-1, keepdims=True)
        e = jnp.exp(s - m)
        l = jnp.sum(e, axis=-1, keepdims=True)
        p = (e * pl.reciprocal(l, approx=approx_recip)).astype(cdt)

        ctx_h = jnp.einsum('bqk,bkd->bqd', p, v_h,
                           preferred_element_type=jnp.float32)
        ctx_heads.append(ctx_h.reshape(bt * qlen, dph))

    ctx = jnp.concatenate(ctx_heads, axis=-1).astype(cdt)  # (bt*qlen, dim)

    out = (jnp.dot(ctx, wo_ref[...], preferred_element_type=jnp.float32)
           + bo_ref[...].astype(jnp.float32))
    o_ref[...] = out.reshape(bt, qlen, dim).astype(o_ref.dtype)


def multi_head_attention(x, mask, params, n_heads, *, dtype=None, b_tile=None):
    """x: (bs, qlen, dim); mask: (bs, klen), nonzero == attend.
    params: PyTorch-layout Linear weights (out, in) and biases (out,).
    dtype: compute dtype for MXU inputs / weight storage (e.g. jnp.bfloat16)."""
    bs, qlen, dim = x.shape
    klen = mask.shape[1]
    assert klen == qlen, "self-attention path only (kv/cache not supported)"
    assert dim % n_heads == 0
    dph = dim // n_heads
    cdt = jnp.dtype(dtype) if dtype is not None else x.dtype

    scale = 1.0 / math.sqrt(dph)
    # PyTorch Linear stores (out, in); transpose to (in, out).  Fuse QKV and
    # fold the query scale into the Q weights / bias.
    w_qkv = jnp.concatenate(
        [params['wq'].T * scale, params['wk'].T, params['wv'].T], axis=1).astype(cdt)
    b_qkv = jnp.concatenate(
        [params['bq'] * scale, params['bk'], params['bv']]).reshape(1, 3 * dim).astype(cdt)
    w_out = params['wo'].T.astype(cdt)
    b_out = params['bo'].reshape(1, dim).astype(cdt)
    x_c = x.astype(cdt)

    # Additive mask bias: finite -1e30 instead of -inf (identical softmax for
    # padding masks, no NaN for fully-masked rows, single VPU add in-kernel).
    mask_bias = jnp.where(mask == 0, jnp.float32(-1e30), jnp.float32(0.0))

    # Batch tile: fold batch rows into M so small qlen still fills the MXU and
    # the ~0.35us per-grid-step overhead is amortized.
    if b_tile is None:
        b_tile = bs
        for cand in range(1, bs + 1):
            if bs % cand == 0 and cand * qlen >= 256:
                b_tile = cand
                break
    assert bs % b_tile == 0

    kernel = functools.partial(mha_kernel, n_heads=n_heads,
                               approx_recip=(cdt == jnp.bfloat16))

    const2 = lambda b: (0, 0)
    return pl.pallas_call(
        kernel,
        out_shape=jax.ShapeDtypeStruct((bs, qlen, dim), cdt),
        grid=(bs // b_tile,),
        in_specs=[
            pl.BlockSpec((b_tile, qlen, dim), lambda b: (b, 0, 0)),   # x block
            pl.BlockSpec((b_tile, klen), lambda b: (b, 0)),           # additive mask
            pl.BlockSpec((dim, 3 * dim), const2),                     # fused QKV weight
            pl.BlockSpec((1, 3 * dim), const2),                       # fused QKV bias
            pl.BlockSpec((dim, dim), const2),                         # out weight
            pl.BlockSpec((1, dim), const2),                           # out bias
        ],
        out_specs=pl.BlockSpec((b_tile, qlen, dim), lambda b: (b, 0, 0)),
        compiler_params=pltpu.CompilerParams(
            dimension_semantics=("parallel",),   # batch axis: shard across TCs (v7x)
            vmem_limit_bytes=32 * 1024 * 1024),
    )(x_c, mask_bias, w_qkv, b_qkv, w_out, b_out)


def mha_reference(x, mask, params, n_heads):
    """Pure-JAX reference mirroring the PyTorch forward (eval mode)."""
    bs, qlen, dim = x.shape
    dph = dim // n_heads

    def lin(t, w, b):
        return jnp.einsum('bqd,od->bqo', t, w) + b

    def shape(t):
        return t.reshape(bs, -1, n_heads, dph).transpose(0, 2, 1, 3)

    q = shape(lin(x, params['wq'], params['bq'])) / math.sqrt(dph)
    k = shape(lin(x, params['wk'], params['bk']))
    v = shape(lin(x, params['wv'], params['bv']))
    scores = jnp.einsum('bhqd,bhkd->bhqk', q, k)
    msk = (mask == 0).reshape(bs, 1, 1, qlen)
    scores = jnp.where(msk, -jnp.inf, scores)
    weights = jax.nn.softmax(scores.astype(jnp.float32), axis=-1)
    ctx = jnp.einsum('bhqk,bhkd->bhqd', weights, v)
    ctx = ctx.transpose(0, 2, 1, 3).reshape(bs, -1, dim)
    return lin(ctx, params['wo'], params['bo'])


if __name__ == "__main__":
    bs, qlen, dim, n_heads = 2, 8, 32, 4

    key = jax.random.PRNGKey(0)
    keys = jax.random.split(key, 10)

    # Deterministic parameters (PyTorch Linear layout (out, in)).
    params = {
        'wq': jax.random.normal(keys[0], (dim, dim), jnp.float32) * 0.05,
        'bq': jax.random.normal(keys[1], (dim,), jnp.float32) * 0.05,
        'wk': jax.random.normal(keys[2], (dim, dim), jnp.float32) * 0.05,
        'bk': jax.random.normal(keys[3], (dim,), jnp.float32) * 0.05,
        'wv': jax.random.normal(keys[4], (dim, dim), jnp.float32) * 0.05,
        'bv': jax.random.normal(keys[5], (dim,), jnp.float32) * 0.05,
        'wo': jax.random.normal(keys[6], (dim, dim), jnp.float32) * 0.05,
        'bo': jax.random.normal(keys[7], (dim,), jnp.float32) * 0.05,
    }

    x = jax.random.normal(keys[8], (bs, qlen, dim), jnp.float32)

    # Padding-style mask: batch 0 fully valid, batch 1 has last 3 keys masked.
    mask = jnp.ones((bs, qlen), jnp.float32)
    mask = mask.at[1, qlen - 3:].set(0.0)

    ref = mha_reference(x, mask, params, n_heads)

    # f32 path: strict parity with the PyTorch-equivalent reference.
    out_f32 = jax.block_until_ready(multi_head_attention(x, mask, params, n_heads))
    assert out_f32.shape == (bs, qlen, dim)
    err32 = jnp.max(jnp.abs(out_f32 - ref))
    assert jnp.allclose(out_f32, ref, atol=1e-4, rtol=1e-4), f"f32 max err {err32}"

    # bf16 path: bf16 MXU inputs / weight DMA, f32 softmax + accumulation.
    out_bf16 = jax.block_until_ready(
        multi_head_attention(x, mask, params, n_heads, dtype=jnp.bfloat16))
    out_bf16_f32 = out_bf16.astype(jnp.float32)
    errbf = jnp.max(jnp.abs(out_bf16_f32 - ref))
    assert jnp.allclose(out_bf16_f32, ref, atol=5e-2, rtol=5e-2), f"bf16 max err {errbf}"

    print("KERNEL_OK")
</pallas_src>

<mosaic_0001>
module attributes {stable_mosaic.version = 11 : i64} {
  func.func @mha_kernel(%arg0: i32, %arg1: memref<2x8x32xf32, #tpu.memory_space<vmem>>, %arg2: memref<2x8xf32, #tpu.memory_space<vmem>>, %arg3: memref<32x96xf32, #tpu.memory_space<vmem>>, %arg4: memref<1x96xf32, #tpu.memory_space<vmem>>, %arg5: memref<32x32xf32, #tpu.memory_space<vmem>>, %arg6: memref<1x32xf32, #tpu.memory_space<vmem>>, %arg7: memref<2x8x32xf32, #tpu.memory_space<vmem>>) attributes {dimension_semantics = [#tpu.dimension_semantics<parallel>], iteration_bounds = array<i64: 1>, scalar_prefetch = 0 : i64, scratch_operands = 0 : i64, tpu.core_type = #tpu.core_type<tc>, window_params = [{transform_indices = @transform_0, window_bounds = array<i64: 2, 8, 32>}, {transform_indices = @transform_1, window_bounds = array<i64: 2, 8>}, {pipeline_mode = #tpu.pipeline_mode<synchronous>, transform_indices = @transform_2, window_bounds = array<i64: 32, 96>}, {pipeline_mode = #tpu.pipeline_mode<synchronous>, transform_indices = @transform_3, window_bounds = array<i64: 1, 96>}, {pipeline_mode = #tpu.pipeline_mode<synchronous>, transform_indices = @transform_4, window_bounds = array<i64: 32, 32>}, {pipeline_mode = #tpu.pipeline_mode<synchronous>, transform_indices = @transform_5, window_bounds = array<i64: 1, 32>}, {transform_indices = @transform_6, window_bounds = array<i64: 2, 8, 32>}]} {
    %c0 = arith.constant 0 : index
    %c0_0 = arith.constant 0 : index
    %c0_1 = arith.constant 0 : index
    %0 = vector.load %arg1[%c0, %c0_0, %c0_1] : memref<2x8x32xf32, #tpu.memory_space<vmem>>, vector<2x8x32xf32>
    %1 = vector.shape_cast %0 : vector<2x8x32xf32> to vector<16x32xf32>
    %c0_2 = arith.constant 0 : index
    %c0_3 = arith.constant 0 : index
    %2 = vector.load %arg3[%c0_2, %c0_3] : memref<32x96xf32, #tpu.memory_space<vmem>>, vector<32x96xf32>
    %cst = arith.constant dense<0.000000e+00> : vector<16x96xf32>
    %3 = tpu.matmul %1, %2, %cst {dimension_numbers = #tpu.dot_dimension_numbers<[1], [0], [0], [1], [0, 0, 1, 1], [], []>} : vector<16x32xf32>, vector<32x96xf32>, vector<16x96xf32> -> vector<16x96xf32>
    %c0_4 = arith.constant 0 : index
    %c0_5 = arith.constant 0 : index
    %4 = vector.load %arg4[%c0_4, %c0_5] : memref<1x96xf32, #tpu.memory_space<vmem>>, vector<1x96xf32>
    %5 = vector.broadcast %4 : vector<1x96xf32> to vector<16x96xf32>
    %6 = arith.addf %3, %5 : vector<16x96xf32>
    %c0_6 = arith.constant 0 : index
    %c0_7 = arith.constant 0 : index
    %7 = vector.load %arg2[%c0_6, %c0_7] : memref<2x8xf32, #tpu.memory_space<vmem>>, vector<2x8xf32>
    %8 = vector.shape_cast %7 : vector<2x8xf32> to vector<2x1x8xf32>
    %9 = vector.extract_strided_slice %6 {offsets = [0, 0], sizes = [16, 8], strides = [1, 1]} : vector<16x96xf32> to vector<16x8xf32>
    %10 = vector.shape_cast %9 : vector<16x8xf32> to vector<2x8x8xf32>
    %11 = vector.extract_strided_slice %6 {offsets = [0, 32], sizes = [16, 8], strides = [1, 1]} : vector<16x96xf32> to vector<16x8xf32>
    %12 = vector.shape_cast %11 : vector<16x8xf32> to vector<2x8x8xf32>
    %13 = vector.extract_strided_slice %6 {offsets = [0, 64], sizes = [16, 8], strides = [1, 1]} : vector<16x96xf32> to vector<16x8xf32>
    %14 = vector.shape_cast %13 : vector<16x8xf32> to vector<2x8x8xf32>
    "tpu.trace_start"() <{level = 10 : i32, message = "bqd,bkd->bqk"}> : () -> ()
    %cst_8 = arith.constant dense<0.000000e+00> : vector<2x8x8xf32>
    %15 = tpu.matmul %10, %12, %cst_8 {dimension_numbers = #tpu.dot_dimension_numbers<[2], [2], [1], [1], [0, 0, 0, 1, 1, 1], [0], [0]>} : vector<2x8x8xf32>, vector<2x8x8xf32>, vector<2x8x8xf32> -> vector<2x8x8xf32>
    "tpu.trace_stop"() : () -> ()
    %16 = vector.broadcast %8 : vector<2x1x8xf32> to vector<2x8x8xf32>
    %17 = arith.addf %15, %16 : vector<2x8x8xf32>
    %cst_9 = arith.constant dense<0xFF800000> : vector<2x8xf32>
    %18 = vector.multi_reduction <maximumf>, %17, %cst_9 [2] : vector<2x8x8xf32> to vector<2x8xf32>
    %19 = vector.shape_cast %18 : vector<2x8xf32> to vector<2x8x1xf32>
    %20 = vector.broadcast %19 : vector<2x8x1xf32> to vector<2x8x8xf32>
    %21 = arith.subf %17, %20 : vector<2x8x8xf32>
    %22 = math.exp %21 : vector<2x8x8xf32>
    %cst_10 = arith.constant dense<0.000000e+00> : vector<2x8xf32>
    %23 = vector.multi_reduction <add>, %22, %cst_10 [2] : vector<2x8x8xf32> to vector<2x8xf32>
    %24 = vector.shape_cast %23 : vector<2x8xf32> to vector<2x8x1xf32>
    %25 = tpu.reciprocal %24 : vector<2x8x1xf32> -> vector<2x8x1xf32>
    %26 = vector.broadcast %25 : vector<2x8x1xf32> to vector<2x8x8xf32>
    %27 = arith.mulf %22, %26 : vector<2x8x8xf32>
    "tpu.trace_start"() <{level = 10 : i32, message = "bqk,bkd->bqd"}> : () -> ()
    %cst_11 = arith.constant dense<0.000000e+00> : vector<2x8x8xf32>
    %28 = tpu.matmul %27, %14, %cst_11 {dimension_numbers = #tpu.dot_dimension_numbers<[2], [1], [1], [2], [0, 0, 0, 1, 1, 2], [0], [0]>} : vector<2x8x8xf32>, vector<2x8x8xf32>, vector<2x8x8xf32> -> vector<2x8x8xf32>
    "tpu.trace_stop"() : () -> ()
    %29 = vector.shape_cast %28 : vector<2x8x8xf32> to vector<16x8xf32>
    %30 = vector.extract_strided_slice %6 {offsets = [0, 8], sizes = [16, 8], strides = [1, 1]} : vector<16x96xf32> to vector<16x8xf32>
    %31 = vector.shape_cast %30 : vector<16x8xf32> to vector<2x8x8xf32>
    %32 = vector.extract_strided_slice %6 {offsets = [0, 40], sizes = [16, 8], strides = [1, 1]} : vector<16x96xf32> to vector<16x8xf32>
    %33 = vector.shape_cast %32 : vector<16x8xf32> to vector<2x8x8xf32>
    %34 = vector.extract_strided_slice %6 {offsets = [0, 72], sizes = [16, 8], strides = [1, 1]} : vector<16x96xf32> to vector<16x8xf32>
    %35 = vector.shape_cast %34 : vector<16x8xf32> to vector<2x8x8xf32>
    "tpu.trace_start"() <{level = 10 : i32, message = "bqd,bkd->bqk"}> : () -> ()
    %cst_12 = arith.constant dense<0.000000e+00> : vector<2x8x8xf32>
    %36 = tpu.matmul %31, %33, %cst_12 {dimension_numbers = #tpu.dot_dimension_numbers<[2], [2], [1], [1], [0, 0, 0, 1, 1, 1], [0], [0]>} : vector<2x8x8xf32>, vector<2x8x8xf32>, vector<2x8x8xf32> -> vector<2x8x8xf32>
    "tpu.trace_stop"() : () -> ()
    %37 = vector.broadcast %8 : vector<2x1x8xf32> to vector<2x8x8xf32>
    %38 = arith.addf %36, %37 : vector<2x8x8xf32>
    %cst_13 = arith.constant dense<0xFF800000> : vector<2x8xf32>
    %39 = vector.multi_reduction <maximumf>, %38, %cst_13 [2] : vector<2x8x8xf32> to vector<2x8xf32>
    %40 = vector.shape_cast %39 : vector<2x8xf32> to vector<2x8x1xf32>
    %41 = vector.broadcast %40 : vector<2x8x1xf32> to vector<2x8x8xf32>
    %42 = arith.subf %38, %41 : vector<2x8x8xf32>
    %43 = math.exp %42 : vector<2x8x8xf32>
    %cst_14 = arith.constant dense<0.000000e+00> : vector<2x8xf32>
    %44 = vector.multi_reduction <add>, %43, %cst_14 [2] : vector<2x8x8xf32> to vector<2x8xf32>
    %45 = vector.shape_cast %44 : vector<2x8xf32> to vector<2x8x1xf32>
    %46 = tpu.reciprocal %45 : vector<2x8x1xf32> -> vector<2x8x1xf32>
    %47 = vector.broadcast %46 : vector<2x8x1xf32> to vector<2x8x8xf32>
    %48 = arith.mulf %43, %47 : vector<2x8x8xf32>
    "tpu.trace_start"() <{level = 10 : i32, message = "bqk,bkd->bqd"}> : () -> ()
    %cst_15 = arith.constant dense<0.000000e+00> : vector<2x8x8xf32>
    %49 = tpu.matmul %48, %35, %cst_15 {dimension_numbers = #tpu.dot_dimension_numbers<[2], [1], [1], [2], [0, 0, 0, 1, 1, 2], [0], [0]>} : vector<2x8x8xf32>, vector<2x8x8xf32>, vector<2x8x8xf32> -> vector<2x8x8xf32>
    "tpu.trace_stop"() : () -> ()
    %50 = vector.shape_cast %49 : vector<2x8x8xf32> to vector<16x8xf32>
    %51 = vector.extract_strided_slice %6 {offsets = [0, 16], sizes = [16, 8], strides = [1, 1]} : vector<16x96xf32> to vector<16x8xf32>
    %52 = vector.shape_cast %51 : vector<16x8xf32> to vector<2x8x8xf32>
    %53 = vector.extract_strided_slice %6 {offsets = [0, 48], sizes = [16, 8], strides = [1, 1]} : vector<16x96xf32> to vector<16x8xf32>
    %54 = vector.shape_cast %53 : vector<16x8xf32> to vector<2x8x8xf32>
    %55 = vector.extract_strided_slice %6 {offsets = [0, 80], sizes = [16, 8], strides = [1, 1]} : vector<16x96xf32> to vector<16x8xf32>
    %56 = vector.shape_cast %55 : vector<16x8xf32> to vector<2x8x8xf32>
    "tpu.trace_start"() <{level = 10 : i32, message = "bqd,bkd->bqk"}> : () -> ()
    %cst_16 = arith.constant dense<0.000000e+00> : vector<2x8x8xf32>
    %57 = tpu.matmul %52, %54, %cst_16 {dimension_numbers = #tpu.dot_dimension_numbers<[2], [2], [1], [1], [0, 0, 0, 1, 1, 1], [0], [0]>} : vector<2x8x8xf32>, vector<2x8x8xf32>, vector<2x8x8xf32> -> vector<2x8x8xf32>
    "tpu.trace_stop"() : () -> ()
    %58 = vector.broadcast %8 : vector<2x1x8xf32> to vector<2x8x8xf32>
    %59 = arith.addf %57, %58 : vector<2x8x8xf32>
    %cst_17 = arith.constant dense<0xFF800000> : vector<2x8xf32>
    %60 = vector.multi_reduction <maximumf>, %59, %cst_17 [2] : vector<2x8x8xf32> to vector<2x8xf32>
    %61 = vector.shape_cast %60 : vector<2x8xf32> to vector<2x8x1xf32>
    %62 = vector.broadcast %61 : vector<2x8x1xf32> to vector<2x8x8xf32>
    %63 = arith.subf %59, %62 : vector<2x8x8xf32>
    %64 = math.exp %63 : vector<2x8x8xf32>
    %cst_18 = arith.constant dense<0.000000e+00> : vector<2x8xf32>
    %65 = vector.multi_reduction <add>, %64, %cst_18 [2] : vector<2x8x8xf32> to vector<2x8xf32>
    %66 = vector.shape_cast %65 : vector<2x8xf32> to vector<2x8x1xf32>
    %67 = tpu.reciprocal %66 : vector<2x8x1xf32> -> vector<2x8x1xf32>
    %68 = vector.broadcast %67 : vector<2x8x1xf32> to vector<2x8x8xf32>
    %69 = arith.mulf %64, %68 : vector<2x8x8xf32>
    "tpu.trace_start"() <{level = 10 : i32, message = "bqk,bkd->bqd"}> : () -> ()
    %cst_19 = arith.constant dense<0.000000e+00> : vector<2x8x8xf32>
    %70 = tpu.matmul %69, %56, %cst_19 {dimension_numbers = #tpu.dot_dimension_numbers<[2], [1], [1], [2], [0, 0, 0, 1, 1, 2], [0], [0]>} : vector<2x8x8xf32>, vector<2x8x8xf32>, vector<2x8x8xf32> -> vector<2x8x8xf32>
    "tpu.trace_stop"() : () -> ()
    %71 = vector.shape_cast %70 : vector<2x8x8xf32> to vector<16x8xf32>
    %72 = vector.extract_strided_slice %6 {offsets = [0, 24], sizes = [16, 8], strides = [1, 1]} : vector<16x96xf32> to vector<16x8xf32>
    %73 = vector.shape_cast %72 : vector<16x8xf32> to vector<2x8x8xf32>
    %74 = vector.extract_strided_slice %6 {offsets = [0, 56], sizes = [16, 8], strides = [1, 1]} : vector<16x96xf32> to vector<16x8xf32>
    %75 = vector.shape_cast %74 : vector<16x8xf32> to vector<2x8x8xf32>
    %76 = vector.extract_strided_slice %6 {offsets = [0, 88], sizes = [16, 8], strides = [1, 1]} : vector<16x96xf32> to vector<16x8xf32>
    %77 = vector.shape_cast %76 : vector<16x8xf32> to vector<2x8x8xf32>
    "tpu.trace_start"() <{level = 10 : i32, message = "bqd,bkd->bqk"}> : () -> ()
    %cst_20 = arith.constant dense<0.000000e+00> : vector<2x8x8xf32>
    %78 = tpu.matmul %73, %75, %cst_20 {dimension_numbers = #tpu.dot_dimension_numbers<[2], [2], [1], [1], [0, 0, 0, 1, 1, 1], [0], [0]>} : vector<2x8x8xf32>, vector<2x8x8xf32>, vector<2x8x8xf32> -> vector<2x8x8xf32>
    "tpu.trace_stop"() : () -> ()
    %79 = vector.broadcast %8 : vector<2x1x8xf32> to vector<2x8x8xf32>
    %80 = arith.addf %78, %79 : vector<2x8x8xf32>
    %cst_21 = arith.constant dense<0xFF800000> : vector<2x8xf32>
    %81 = vector.multi_reduction <maximumf>, %80, %cst_21 [2] : vector<2x8x8xf32> to vector<2x8xf32>
    %82 = vector.shape_cast %81 : vector<2x8xf32> to vector<2x8x1xf32>
    %83 = vector.broadcast %82 : vector<2x8x1xf32> to vector<2x8x8xf32>
    %84 = arith.subf %80, %83 : vector<2x8x8xf32>
    %85 = math.exp %84 : vector<2x8x8xf32>
    %cst_22 = arith.constant dense<0.000000e+00> : vector<2x8xf32>
    %86 = vector.multi_reduction <add>, %85, %cst_22 [2] : vector<2x8x8xf32> to vector<2x8xf32>
    %87 = vector.shape_cast %86 : vector<2x8xf32> to vector<2x8x1xf32>
    %88 = tpu.reciprocal %87 : vector<2x8x1xf32> -> vector<2x8x1xf32>
    %89 = vector.broadcast %88 : vector<2x8x1xf32> to vector<2x8x8xf32>
    %90 = arith.mulf %85, %89 : vector<2x8x8xf32>
    "tpu.trace_start"() <{level = 10 : i32, message = "bqk,bkd->bqd"}> : () -> ()
    %cst_23 = arith.constant dense<0.000000e+00> : vector<2x8x8xf32>
    %91 = tpu.matmul %90, %77, %cst_23 {dimension_numbers = #tpu.dot_dimension_numbers<[2], [1], [1], [2], [0, 0, 0, 1, 1, 2], [0], [0]>} : vector<2x8x8xf32>, vector<2x8x8xf32>, vector<2x8x8xf32> -> vector<2x8x8xf32>
    "tpu.trace_stop"() : () -> ()
    %92 = vector.shape_cast %91 : vector<2x8x8xf32> to vector<16x8xf32>
    %93 = tpu.concatenate %29, %50, %71, %92 in 1 : vector<16x8xf32>, vector<16x8xf32>, vector<16x8xf32>, vector<16x8xf32> -> vector<16x32xf32>
    %c0_24 = arith.constant 0 : index
    %c0_25 = arith.constant 0 : index
    %94 = vector.load %arg5[%c0_24, %c0_25] : memref<32x32xf32, #tpu.memory_space<vmem>>, vector<32x32xf32>
    %cst_26 = arith.constant dense<0.000000e+00> : vector<16x32xf32>
    %95 = tpu.matmul %93, %94, %cst_26 {dimension_numbers = #tpu.dot_dimension_numbers<[1], [0], [0], [1], [0, 0, 1, 1], [], []>} : vector<16x32xf32>, vector<32x32xf32>, vector<16x32xf32> -> vector<16x32xf32>
    %c0_27 = arith.constant 0 : index
    %c0_28 = arith.constant 0 : index
    %96 = vector.load %arg6[%c0_27, %c0_28] : memref<1x32xf32, #tpu.memory_space<vmem>>, vector<1x32xf32>
    %97 = vector.broadcast %96 : vector<1x32xf32> to vector<16x32xf32>
    %98 = arith.addf %95, %97 : vector<16x32xf32>
    %99 = vector.shape_cast %98 : vector<16x32xf32> to vector<2x8x32xf32>
    %c0_29 = arith.constant 0 : index
    %c0_30 = arith.constant 0 : index
    %c0_31 = arith.constant 0 : index
    %100 = vector.load %arg7[%c0_29, %c0_30, %c0_31] : memref<2x8x32xf32, #tpu.memory_space<vmem>>, vector<2x8x32xf32>
    tpu.vector_store %arg7[%c0_29, %c0_30, %c0_31], %99 {strides = array<i32>} : memref<2x8x32xf32, #tpu.memory_space<vmem>>, vector<2x8x32xf32>,
    return
  }
  func.func @transform_0(%arg0: i32) -> (i32, i32, i32) {
    %c0_i32 = arith.constant 0 : i32
    %c0_i32_0 = arith.constant 0 : i32
    %c0_i32_1 = arith.constant 0 : i32
    return %arg0, %c0_i32, %c0_i32_0 : i32, i32, i32
  }
  func.func @transform_1(%arg0: i32) -> (i32, i32) {
    %c0_i32 = arith.constant 0 : i32
    %c0_i32_0 = arith.constant 0 : i32
    return %arg0, %c0_i32 : i32, i32
  }
  func.func @transform_2(%arg0: i32) -> (i32, i32) {
    %c0_i32 = arith.constant 0 : i32
    %c0_i32_0 = arith.constant 0 : i32
    %c0_i32_1 = arith.constant 0 : i32
    return %c0_i32, %c0_i32_0 : i32, i32
  }
  func.func @transform_3(%arg0: i32) -> (i32, i32) {
    %c0_i32 = arith.constant 0 : i32
    %c0_i32_0 = arith.constant 0 : i32
    %c0_i32_1 = arith.constant 0 : i32
    return %c0_i32, %c0_i32_0 : i32, i32
  }
  func.func @transform_4(%arg0: i32) -> (i32, i32) {
    %c0_i32 = arith.constant 0 : i32
    %c0_i32_0 = arith.constant 0 : i32
    %c0_i32_1 = arith.constant 0 : i32
    return %c0_i32, %c0_i32_0 : i32, i32
  }
  func.func @transform_5(%arg0: i32) -> (i32, i32) {
    %c0_i32 = arith.constant 0 : i32
    %c0_i32_0 = arith.constant 0 : i32
    %c0_i32_1 = arith.constant 0 : i32
    return %c0_i32, %c0_i32_0 : i32, i32
  }
  func.func @transform_6(%arg0: i32) -> (i32, i32, i32) {
    %c0_i32 = arith.constant 0 : i32
    %c0_i32_0 = arith.constant 0 : i32
    %c0_i32_1 = arith.constant 0 : i32
    return %arg0, %c0_i32, %c0_i32_0 : i32, i32, i32
  }
}

</mosaic_0001>

<bundles_post_ra>
// kernel: tpu_custom_call.1
= control target key start
LH: loop header
LB: loop body
LE: loop exit
PB: predicated region body
PF: predicated region fallthrough
CT: control target
= control target key end

     0   :  { %11 = vsyncpa [#allocation3], 0  ;;  %s2281_s0 = inlined_call_operand.hbm [shape: f32[2,8,32], index: 0, kind: input, shape index: {}]   ;;  %s2282_s1 = inlined_call_operand.vmem [shape: f32[2,8], index: 1, kind: input, shape index: {}]   ;;  %s2283_s2 = inlined_call_operand.hbm [shape: f32[32,96], index: 2, kind: input, shape index: {}]   ;;  %s2284_s3 = inlined_call_operand.vmem [shape: f32[1,96], index: 3, kind: input, shape index: {}]   ;;  %s2285_s4 = inlined_call_operand.hbm [shape: f32[32,32], index: 4, kind: input, shape index: {}]   ;;  %s2286_s5 = inlined_call_operand.vmem [shape: f32[1,32], index: 5, kind: input, shape index: {}]   ;;  %s2287_s6 = inlined_call_operand.hbm [shape: f32[2,8,32], index: 6, kind: output, shape index: {}]  }
   0x1   :  { %12 = vsyncpa [#allocation6], 0 }
   0x2   :  { %13 = vsyncpa [#allocation4], 0  ;;  %s1998_s21 = smov [#allocation5]   ;;  %s1999_s23 = smov [#allocation2]  }
   0x3   :  { %s33_s22 = sshll.u32 %s1998_s21, 4  ;;  %s19_s24 = sshll.u32 %s1999_s23, 4  ;;  %s34_s22 = int_to_ptr.vmem [resolvable:$true] %s33_s22  ;;  %s2055_s24 = int_to_ptr.vmem [resolvable:$true] %s19_s24 }
   0x4   :  { %s1904_s27 = scalar_lea.hbm %s2283_s2, 512 }
   0x5   :  { %p1905_p0 = scmp.ne.s32.totalorder %s2283_s2, %s1904_s27  ;;  %p1908_p1 = scmp.lt.u32.totalorder %s1904_s27, %s2283_s2 }
   0x7   :  { %p1910_p2 = pnand %p1908_p1, %p1905_p0 }
   0x9   :  { %1913 = shalt.err (!%p1910_p2)
}
   0xa   :  { %s1914_s8 = scalar_lea.vmem %s34_s22, 512  ;;  %p1919_p4 = scmp.lt.s32.totalorder %s34_s22, %s34_s22 }
   0xb   :  { %p1915_p3 = scmp.ne.s32.totalorder %s34_s22, %s1914_s8  ;;  %p1920_p5 = scmp.lt.s32.totalorder %s1914_s8, %s1914_s8 }
   0xd   :  { %p1921_p6 = por %p1920_p5, %p1919_p4 }
   0xf   :  { %p1922_p7 = pnand %p1921_p6, %p1915_p3 }
  0x11   :  { %1925 = shalt.err (!%p1922_p7)
}
  0x12   :  { %s2000_s9 = smov 128   ;;  %s2001_s10 = smov 8  }
  0x13   :  { %39 = dma.hbm_to_vmem [thread:$0]  %s2283_s2, 512, %s34_s22, [#allocation6], %s2000_s9, %s2000_s9, %s2001_s10  }
  0x14   :  { %s1926_s15 = scalar_lea.hbm %s2281_s0, 256 }
  0x15   :  { %p1927_p8 = scmp.ne.s32.totalorder %s2281_s0, %s1926_s15  ;;  %p1930_p9 = scmp.lt.u32.totalorder %s1926_s15, %s2281_s0 }
  0x17   :  { %p1932_p10 = pnand %p1930_p9, %p1927_p8 }
  0x19   :  { %1935 = shalt.err (!%p1932_p10)
}
  0x1a   :  { %s1936_s20 = scalar_lea.vmem %s2055_s24, 256  ;;  %p1941_p12 = scmp.lt.s32.totalorder %s2055_s24, %s2055_s24 }
  0x1b   :  { %p1937_p11 = scmp.ne.s32.totalorder %s2055_s24, %s1936_s20  ;;  %p1942_p13 = scmp.lt.s32.totalorder %s1936_s20, %s1936_s20 }
  0x1d   :  { %p1943_p0 = por %p1942_p13, %p1941_p12 }
  0x1f   :  { %p1944_p1 = pnand %p1943_p0, %p1937_p11 }
  0x21   :  { %1947 = shalt.err (!%p1944_p1)
}
  0x22   :  { %25 = dma.hbm_to_vmem [thread:$0]  %s2281_s0, 256, %s2055_s24, [#allocation3], %s2000_s9, %s2000_s9, %s2001_s10  }
  0x23   :  { %s2002_s22 = smov [#allocation7]   ;;  %s1948_s27 = scalar_lea.hbm %s2285_s4, 512 }
  0x24   :  { %s47_s23 = sshll.u32 %s2002_s22, 4  ;;  %p1949_p2 = scmp.ne.s32.totalorder %s2285_s4, %s1948_s27  ;;  %s48_s23 = int_to_ptr.vmem [resolvable:$true] %s47_s23 }
  0x25   :  { %p1952_p3 = scmp.lt.u32.totalorder %s1948_s27, %s2285_s4 }
  0x27   :  { %p1954_p4 = pnand %p1952_p3, %p1949_p2 }
  0x29   :  { %1957 = shalt.err (!%p1954_p4)
}
  0x2a   :  { %s1958_s8 = scalar_lea.vmem %s48_s23, 512  ;;  %p1963_p6 = scmp.lt.s32.totalorder %s48_s23, %s48_s23 }
  0x2b   :  { %p1959_p5 = scmp.ne.s32.totalorder %s48_s23, %s1958_s8  ;;  %p1964_p7 = scmp.lt.s32.totalorder %s1958_s8, %s1958_s8 }
  0x2d   :  { %p1965_p8 = por %p1964_p7, %p1963_p6 }
  0x2f   :  { %p1966_p9 = pnand %p1965_p8, %p1959_p5 }
  0x31   :  { %1969 = shalt.err (!%p1966_p9)
}
  0x32   :  { %53 = dma.hbm_to_vmem [thread:$0]  %s2285_s4, 512, %s48_s23, [#allocation6], %s2000_s9, %s2000_s9, %s2001_s10  }
  0x33   :  { %1992 = dma.done.wait [#allocation3], 256  }
  0x34   :  { %1993 = vsyncadd [#allocation3], 4294967040 }
  0x35   :  { %1994 = dma.done.wait [#allocation6], 1024  }
  0x36   :  { %1995 = vsyncadd [#allocation6], 4294966272  ;;  %vm78_vm0 = vcmask 261120   ;;  %v67_v0 = vld [vmem:[#allocation5] sm:$0xff]  ;;  %v68_v1 = vld [vmem:[#allocation5 + $0x8] sm:$0xff]  ;;  %v2003_v8 = vmov 0.0   ;;  %v173_v18 = vlaneseq }
  0x37   :  { %v69_v2 = vld [vmem:[#allocation5 + $0x10] sm:$0xff]  ;;  %v1834_v3 = vpack.c.bf16 %v68_v1, %v67_v0  ;;  %v70_v4 = vld [vmem:[#allocation5 + $0x18] sm:$0xff]  ;;  %1743 = vmatprep.subr.mxu1 %v2003_v8  ;;  %vm2004_vm1 = vmmov 0   ;;  %s2005_s12 = smov 96   ;;  %vm197_vm2 = vcmask 64512   ;;  %s2008_s14 = smov 88  }
  0x38   :  { %v65_v5 = vld [vmem:[#allocation2] sm:$0xff]  ;;  %v1838_v6 = vpack.c.bf16 %v70_v4, %v69_v2  ;;  %v66_v7 = vld [vmem:[#allocation2 + $0x8] sm:$0xff]  ;;  %1745 = vmatprep.mubr.msk.f32.mxu1 %vm2004_vm1, %v2003_v8  ;;  %v2006_v16 = vmov 1966171168   ;;  %v174_v20 = vshrl.u32 %v173_v18, 7  ;;  %s2009_s15 = smov 120  }
  0x39   :  { %1740 = vmatprep.mubr.msk.f32.mxu0 %vm78_vm0, %v65_v5  ;;  %1835 = vmatprep.subr.bf16.mxu0 %v1834_v3  ;;  %v1657_v9 = vld [vmem:[%s2284_s3] ss:$0 sm:$0xff]  ;;  %v171_v17 = vunpack.c.l.s4 %v2006_v16  ;;  %s2010_s16 = smov 56   ;;  %s2011_s17 = smov 112   ;;  %vm1542_vm3 = vcmask 195584   ;;  %vm1539_vm4 = vcmask 130048  }
  0x3a   :  { %1837 = vmatpush3.bf16.msra.mxu0 %v1834_v3  ;;  %v1660_v22 = vld.sshfl [vmem:[%s2282_s1] sm:$0x11 pattern:$0x75316420]  ;;  %v186_v24 = vsub.s32 0, %v174_v20  ;;  %s2007_s1 = smov 64  }
  0x3b   :  { %1839 = vmatprep.subr.bf16.mxu0 %v1838_v6  ;;  %v172_v19 = vunpack.c.0.s8 %v171_v17  ;;  %v169_v25 = vcombine.high %v1660_v22, %v1660_v22  ;;  %s2012_s18 = smov 80   ;;  %s2013_s19 = smov 48  }
  0x3c   :  { %s2014_s20 = smov 72   ;;  %s2015_s2 = smov 104  }
  0x3d   :  { %v175_v21 = vsub.s32 %v172_v19, %v174_v20  ;;  %s2016_s21 = smov 40   ;;  %s2017_s22 = smov 16  }
  0x3e   :  { %1841 = vmatpush3.bf16.msra.mxu0 %v1838_v6  ;;  %s2018_s23 = smov 24   ;;  %s2019_s27 = smov [#allocation8]  }
  0x3f   :  { %1763 = vmatprep.subr.mxu0 %v2003_v8  ;;  %v176_v23 = vrot.slane %v1660_v22, %v175_v21  ;;  %v183_v27 = vrot.slane %v169_v25, %v175_v21  ;;  %s1644_s28 = sshll.u32 %s2019_s27, 4  ;;  %s1645_s28 = int_to_ptr.vmem [resolvable:$true] %s1644_s28 }
  0x40   :  { %s1970_s29 = scalar_lea.vmem %s1645_s28, 256  ;;  %p1975_p11 = scmp.lt.s32.totalorder %s1645_s28, %s1645_s28 }
  0x41   :  { %1741 = vmatmul.mubr.msk.f32.vlgmr.msra.gmra.mrb[0].mxu0 %vm78_vm0, %v66_v7  ;;  %v2139_v26 = vrot.slane %v176_v23, %v186_v24  ;;  %v2142_v31 = vrot.slane %v183_v27, %v186_v24  ;;  %p1971_p10 = scmp.ne.s32.totalorder %s1645_s28, %s1970_s29  ;;  %p1976_p12 = scmp.lt.s32.totalorder %s1970_s29, %s1970_s29 }
  0x42   :  { %1765 = vmatprep.mubr.msk.f32.mxu0 %vm2004_vm1, %v2003_v8 }
  0x43   :  { %p1977_p13 = por %p1976_p12, %p1975_p11 }
  0x45   :  { %p1978_p0 = pnand %p1977_p13, %p1971_p10 }
 0x114   :  { %v1742_v10 = vpop.f32.mrb[0].mxu0 }
 0x115   :  { %v151_v11 = vpop.f32.mrb[1].mxu0  ;;  %v2121_v13 = vadd.f32 %v1742_v10, %v1657_v9 }
 0x116   :  { %v2118_v12 = vadd.f32 %v1657_v9, %v151_v11 }
 0x118   :  { %195 = vrot.lane.b32.xlu0 %v2118_v12, %s2005_s12 }
 0x11c   :  { %273 = vrot.lane.b32.xlu0 %v2121_v13, %s2005_s12 }
 0x18a   :  { %v196_v14 = vpop.permute.xlu0 %195 }
 0x18b   :  { %1744 = vmatpush3.xpose.msk.msra.mxu1 %vm197_vm2, %v196_v14 }
 0x18c   :  { %1748 = vmatprep.subr.mxu1 %v2003_v8 }
 0x18e   :  { %1746 = vmatmul.mubr.msk.f32.vlgmr.msra.gmra.mrb[0].mxu1 %vm197_vm2, %v2118_v12  ;;  %v274_v15 = vpop.permute.xlu0 %273 }
 0x18f   :  { %1749 = vmatpush3.xpose.msk.msra.mxu1 %vm197_vm2, %v274_v15  ;;  %1750 = vmatprep.mubr.msk.f32.mxu1 %vm2004_vm1, %v2003_v8 }
 0x190   :  { %1753 = vmatprep.subr.mxu1 %v2003_v8 }
 0x192   :  { %1751 = vmatmul.mubr.msk.f32.vlgmr.msra.gmra.mrb[2].mxu1 %vm197_vm2, %v2121_v13 }
 0x193   :  { %1755 = vmatprep.mubr.msk.f32.mxu1 %vm2004_vm1, %v2003_v8 }
 0x261   :  { %v268_v28 = vpop.f32.mrb[0].mxu1 }
 0x262   :  { %v269_v29 = vadd.f32 %v268_v28, %v2139_v26  ;;  %v1747_v30 = vpop.f32.mrb[1].mxu1 }
 0x264   :  { %v349_v32 = vsel %vm197_vm2, %v269_v29, -inf }
 0x265   :  { %350 = vmax.xlane.f32.xlu1 %v349_v32  ;;  %v345_v33 = vpop.f32.mrb[2].mxu1 }
 0x266   :  { %v346_v34 = vadd.f32 %v345_v33, %v2142_v31  ;;  %v1752_v35 = vpop.f32.mrb[3].mxu1 }
 0x268   :  { %v352_v36 = vsel %vm197_vm2, %v346_v34, -inf }
 0x269   :  { %353 = vmax.xlane.f32.xlu1 %v352_v36 }
 0x27a   :  { %371 = vrot.lane.b32.xlu1 %v2118_v12, %s2007_s1 }
 0x27e   :  { %447 = vrot.lane.b32.xlu1 %v2121_v13, %s2007_s1 }
 0x282   :  { %525 = vrot.lane.b32.xlu1 %v2118_v12, %s2008_s14 }
 0x286   :  { %603 = vrot.lane.b32.xlu1 %v2121_v13, %s2008_s14 }
 0x2f2   :  { %v351_v37 = vpop.xlane.xlu1 %350 }
 0x2f3   :  { %v355_v38 = vsub.f32 %v269_v29, %v351_v37 }
 0x2f5   :  { %v357_v39 = vmul.f32 1.442695, %v355_v38 }
 0x2f6   :  { %v354_v40 = vpop.xlane.xlu1 %353 }
 0x2f7   :  { %1872 = vpow2.f32 %v357_v39  ;;  %v356_v41 = vsub.f32 %v346_v34, %v354_v40 }
 0x2f9   :  { %v359_v42 = vmul.f32 1.442695, %v356_v41 }
 0x2fa   :  { %v372_v43 = vpop.permute.xlu1 %371 }
 0x2fb   :  { %1874 = vpow2.f32 %v359_v42  ;;  %1754 = vmatpush3.msra.mxu1 %v372_v43 }
 0x2fc   :  { %1758 = vmatprep.subr.mxu1 %v2003_v8 }
 0x2fe   :  { %v448_v44 = vpop.permute.xlu1 %447 }
 0x301   :  { %v1873_v45 = vpop.eup %1872 }
 0x302   :  { %v526_v46 = vpop.permute.xlu1 %525  ;;  %v361_v47 = vsel %vm197_vm2, %v1873_v45, 0.0 }
 0x303   :  { %362 = vadd.xlane.f32.xlu0 %v361_v47  ;;  %1764 = vmatpush3.xpose.msk.msra.mxu0 %vm197_vm2, %v526_v46 }
 0x304   :  { %1773 = vmatprep.subr.mxu0 %v2003_v8 }
 0x305   :  { %v1875_v48 = vpop.eup %1874 }
 0x306   :  { %v364_v49 = vsel %vm197_vm2, %v1875_v48, 0.0  ;;  %v604_v50 = vpop.permute.xlu1 %603 }
 0x307   :  { %365 = vadd.xlane.f32.xlu1 %v364_v49 }
 0x318   :  { %601 = vrot.lane.b32.xlu1 %v2121_v13, %s2009_s15 }
 0x319   :  { %523 = vrot.lane.b32.xlu0 %v2118_v12, %s2009_s15 }
 0x390   :  { %v363_v51 = vpop.xlane.xlu0 %362 }
 0x391   :  { %1876 = vrcp.f32 %v363_v51 }
 0x394   :  { %v366_v52 = vpop.xlane.xlu1 %365  ;;  %v524_v53 = vpop.permute.xlu0 %523 }
 0x395   :  { %1878 = vrcp.f32 %v366_v52  ;;  %1766 = vmatmul.mubr.msk.f32.vlgmr.msra.gmra.mrb[2].mxu0 %vm197_vm2, %v524_v53 }
 0x396   :  { %1775 = vmatprep.mubr.msk.f32.mxu0 %vm2004_vm1, %v2003_v8 }
 0x398   :  { %v602_v58 = vpop.permute.xlu1 %601 }
 0x39b   :  { %v1877_v54 = vpop.eup %1876 }
 0x39c   :  { %v369_v55 = vmul.f32 %v1877_v54, %v1873_v45 }
 0x39e   :  { %1756 = vmatmul.mubr.msk.f32.vlgmr.msra.gmra.mrb[4].mxu1 %vm197_vm2, %v369_v55 }
 0x39f   :  { %v1879_v56 = vpop.eup %1878  ;;  %1759 = vmatpush3.msra.mxu1 %v448_v44  ;;  %1760 = vmatprep.mubr.msk.f32.mxu1 %vm2004_vm1, %v2003_v8 }
 0x3a0   :  { %v370_v57 = vmul.f32 %v1879_v56, %v1875_v48  ;;  %1768 = vmatprep.subr.mxu1 %v2003_v8 }
 0x3a2   :  { %1761 = vmatmul.mubr.msk.f32.vlgmr.msra.gmra.mrb[6].mxu1 %vm197_vm2, %v370_v57 }
 0x3a3   :  { %1770 = vmatprep.mubr.msk.f32.mxu1 %vm2004_vm1, %v2003_v8 }
 0x3a6   :  { %1769 = vmatpush3.xpose.msk.msra.mxu1 %vm197_vm2, %v604_v50 }
 0x3a7   :  { %1778 = vmatprep.subr.mxu1 %v2003_v8 }
 0x3a9   :  { %1771 = vmatmul.mubr.msk.f32.vlgmr.msra.gmra.mrb[8].mxu1 %vm197_vm2, %v602_v58 }
 0x3aa   :  { %1780 = vmatprep.mubr.msk.f32.mxu1 %vm2004_vm1, %v2003_v8 }
 0x468   :  { %v597_v59 = vpop.f32.mrb[2].mxu0 }
 0x469   :  { %v598_v60 = vadd.f32 %v597_v59, %v2139_v26  ;;  %v1767_v61 = vpop.f32.mrb[3].mxu0 }
 0x46b   :  { %v679_v62 = vsel %vm197_vm2, %v598_v60, -inf }
 0x46c   :  { %680 = vmax.xlane.f32.xlu1 %v679_v62 }
 0x471   :  { %v2175_v63 = vpop.f32.mrb[4].mxu1 }
 0x472   :  { %v1757_v0 = vpop.f32.mrb[5].mxu1 }
 0x475   :  { %v2177_v1 = vpop.f32.mrb[6].mxu1 }
 0x476   :  { %v1762_v2 = vpop.f32.mrb[7].mxu1 }
 0x47c   :  { %v675_v3 = vpop.f32.mrb[8].mxu1 }
 0x47d   :  { %v676_v4 = vadd.f32 %v675_v3, %v2142_v31  ;;  %v1772_v5 = vpop.f32.mrb[9].mxu1 }
 0x47f   :  { %v682_v6 = vsel %vm197_vm2, %v676_v4, -inf }
 0x480   :  { %683 = vmax.xlane.f32.xlu0 %v682_v6 }
 0x496   :  { %777 = vrot.lane.b32.xlu0 %v2121_v13, %s2010_s16 }
 0x49a   :  { %853 = vrot.lane.b32.xlu0 %v2118_v12, %s2011_s17 }
 0x4f9   :  { %v681_v7 = vpop.xlane.xlu1 %680 }
 0x4fa   :  { %v685_v9 = vsub.f32 %v598_v60, %v681_v7 }
 0x4fc   :  { %v687_v10 = vmul.f32 1.442695, %v685_v9 }
 0x4fe   :  { %1880 = vpow2.f32 %v687_v10 }
 0x508   :  { %v1881_v11 = vpop.eup %1880 }
 0x509   :  { %v691_v14 = vsel %vm197_vm2, %v1881_v11, 0.0 }
 0x50a   :  { %692 = vadd.xlane.f32.xlu1 %v691_v14 }
 0x50d   :  { %v684_v15 = vpop.xlane.xlu0 %683 }
 0x50e   :  { %v686_v17 = vsub.f32 %v676_v4, %v684_v15 }
 0x510   :  { %v689_v18 = vmul.f32 1.442695, %v686_v17 }
 0x511   :  { %v778_v16 = vpop.permute.xlu0 %777 }
 0x512   :  { %1779 = vmatpush3.msra.mxu1 %v778_v16  ;;  %1882 = vpow2.f32 %v689_v18 }
 0x513   :  { %1788 = vmatprep.subr.mxu1 %v2003_v8 }
 0x515   :  { %v854_v27 = vpop.permute.xlu0 %853 }
 0x51b   :  { %701 = vrot.lane.b32.xlu1 %v2118_v12, %s2010_s16 }
 0x51c   :  { %v1883_v19 = vpop.eup %1882 }
 0x51d   :  { %v694_v20 = vsel %vm197_vm2, %v1883_v19, 0.0 }
 0x51f   :  { %855 = vrot.lane.b32.xlu1 %v2118_v12, %s2012_s18 }
 0x523   :  { %933 = vrot.lane.b32.xlu1 %v2121_v13, %s2012_s18 }
 0x547   :  { %695 = vadd.xlane.f32.xlu1 %v694_v20 }
 0x558   :  { %931 = vrot.lane.b32.xlu1 %v2121_v13, %s2011_s17 }
 0x597   :  { %v693_v21 = vpop.xlane.xlu1 %692 }
 0x598   :  { %1884 = vrcp.f32 %v693_v21 }
 0x59b   :  { %v702_v22 = vpop.permute.xlu1 %701 }
 0x59c   :  { %1774 = vmatpush3.msra.mxu0 %v702_v22 }
 0x59d   :  { %1783 = vmatprep.subr.mxu0 %v2003_v8 }
 0x59f   :  { %v856_v25 = vpop.permute.xlu1 %855 }
 0x5a2   :  { %v1885_v23 = vpop.eup %1884 }
 0x5a3   :  { %v699_v24 = vmul.f32 %v1885_v23, %v1881_v11  ;;  %v934_v28 = vpop.permute.xlu1 %933 }
 0x5a5   :  { %1776 = vmatmul.mubr.msk.f32.vlgmr.msra.gmra.mrb[4].mxu0 %vm197_vm2, %v699_v24 }
 0x5a6   :  { %1784 = vmatpush3.xpose.msk.msra.mxu0 %vm197_vm2, %v856_v25  ;;  %1785 = vmatprep.mubr.msk.f32.mxu0 %vm2004_vm1, %v2003_v8 }
 0x5a7   :  { %1793 = vmatprep.subr.mxu0 %v2003_v8 }
 0x5a9   :  { %1786 = vmatmul.mubr.msk.f32.vlgmr.msra.gmra.mrb[6].mxu0 %vm197_vm2, %v854_v27 }
 0x5aa   :  { %1795 = vmatprep.mubr.msk.f32.mxu0 %vm2004_vm1, %v2003_v8 }
 0x5d4   :  { %v696_v29 = vpop.xlane.xlu1 %695 }
 0x5d5   :  { %1886 = vrcp.f32 %v696_v29 }
 0x5d8   :  { %v932_v33 = vpop.permute.xlu1 %931 }
 0x5df   :  { %v1887_v30 = vpop.eup %1886 }
 0x5e0   :  { %v700_v32 = vmul.f32 %v1887_v30, %v1883_v19 }
 0x5e2   :  { %1781 = vmatmul.mubr.msk.f32.vlgmr.msra.gmra.mrb[10].mxu1 %vm197_vm2, %v700_v32 }
 0x5e3   :  { %1789 = vmatpush3.xpose.msk.msra.mxu1 %vm197_vm2, %v934_v28  ;;  %1790 = vmatprep.mubr.msk.f32.mxu1 %vm2004_vm1, %v2003_v8 }
 0x5e4   :  { %1798 = vmatprep.subr.mxu1 %v2003_v8 }
 0x5e6   :  { %1791 = vmatmul.mubr.msk.f32.vlgmr.msra.gmra.mrb[12].mxu1 %vm197_vm2, %v932_v33 }
 0x5e7   :  { %1800 = vmatprep.mubr.msk.f32.mxu1 %vm2004_vm1, %v2003_v8 }
 0x678   :  { %v2207_v34 = vpop.f32.mrb[4].mxu0 }
 0x679   :  { %v1777_v35 = vpop.f32.mrb[5].mxu0 }
 0x67c   :  { %v927_v36 = vpop.f32.mrb[6].mxu0 }
 0x67d   :  { %v928_v37 = vadd.f32 %v927_v36, %v2139_v26  ;;  %v1787_v38 = vpop.f32.mrb[7].mxu0 }
 0x67e   :  { %v1546_v38 = vld [vmem:[#allocation7 + $0x8] sm:$0xff] }
 0x67f   :  { %v1009_v39 = vsel %vm197_vm2, %v928_v37, -inf }
 0x680   :  { %1010 = vmax.xlane.f32.xlu0 %v1009_v39  ;;  %v1547_v39 = vld [vmem:[#allocation7 + $0x10] sm:$0xff] }
 0x6b5   :  { %v2211_v40 = vpop.f32.mrb[10].mxu1 }
 0x6b6   :  { %v1782_v41 = vpop.f32.mrb[11].mxu1 }
 0x6b9   :  { %v1005_v42 = vpop.f32.mrb[12].mxu1 }
 0x6ba   :  { %v1006_v43 = vadd.f32 %v1005_v42, %v2142_v31  ;;  %v1792_v44 = vpop.f32.mrb[13].mxu1 }
 0x6bc   :  { %v1012_v45 = vsel %vm197_vm2, %v1006_v43, -inf }
 0x6bd   :  { %1013 = vmax.xlane.f32.xlu1 %v1012_v45 }
 0x6ce   :  { %1031 = vrot.lane.b32.xlu1 %v2118_v12, %s2013_s19 }
 0x6d2   :  { %1185 = vrot.lane.b32.xlu1 %v2118_v12, %s2014_s20 }
 0x6d6   :  { %1263 = vrot.lane.b32.xlu1 %v2121_v13, %s2014_s20 }
 0x6da   :  { %1261 = vrot.lane.b32.xlu1 %v2121_v13, %s2015_s2 }
 0x70d   :  { %v1011_v46 = vpop.xlane.xlu0 %1010 }
 0x70e   :  { %v1015_v47 = vsub.f32 %v928_v37, %v1011_v46  ;;  %v1545_v37 = vld [vmem:[#allocation7] sm:$0xff] }
 0x710   :  { %v1017_v48 = vmul.f32 1.442695, %v1015_v47 }
 0x712   :  { %1888 = vpow2.f32 %v1017_v48 }
 0x71c   :  { %v1889_v49 = vpop.eup %1888 }
 0x71d   :  { %v1021_v50 = vsel %vm197_vm2, %v1889_v49, 0.0 }
 0x71e   :  { %1022 = vadd.xlane.f32.xlu0 %v1021_v50 }
 0x734   :  { %1107 = vrot.lane.b32.xlu0 %v2121_v13, %s2013_s19 }
 0x74a   :  { %v1014_v51 = vpop.xlane.xlu1 %1013 }
 0x74b   :  { %v1016_v52 = vsub.f32 %v1006_v43, %v1014_v51 }
 0x74d   :  { %v1019_v53 = vmul.f32 1.442695, %v1016_v52 }
 0x74e   :  { %v1032_v54 = vpop.permute.xlu1 %1031 }
 0x74f   :  { %1890 = vpow2.f32 %v1019_v53  ;;  %1794 = vmatpush3.msra.mxu0 %v1032_v54 }
 0x750   :  { %1803 = vmatprep.subr.mxu0 %v2003_v8 }
 0x752   :  { %v1186_v61 = vpop.permute.xlu1 %1185 }
 0x756   :  { %v1264_v3 = vpop.permute.xlu1 %1263 }
 0x759   :  { %v1891_v55 = vpop.eup %1890 }
 0x75a   :  { %v1024_v56 = vsel %vm197_vm2, %v1891_v55, 0.0  ;;  %v1262_v5 = vpop.permute.xlu1 %1261 }
 0x75b   :  { %1025 = vadd.xlane.f32.xlu0 %v1024_v56 }
 0x771   :  { %1183 = vrot.lane.b32.xlu0 %v2118_v12, %s2015_s2 }
 0x7ab   :  { %v1023_v57 = vpop.xlane.xlu0 %1022 }
 0x7ac   :  { %1892 = vrcp.f32 %v1023_v57 }
 0x7af   :  { %v1108_v58 = vpop.permute.xlu0 %1107 }
 0x7b0   :  { %1799 = vmatpush3.msra.mxu1 %v1108_v58 }
 0x7b1   :  { %1808 = vmatprep.subr.mxu1 %v2003_v8 }
 0x7b6   :  { %v1893_v59 = vpop.eup %1892 }
 0x7b7   :  { %v1029_v60 = vmul.f32 %v1893_v59, %v1889_v49 }
 0x7b9   :  { %1796 = vmatmul.mubr.msk.f32.vlgmr.msra.gmra.mrb[8].mxu0 %vm197_vm2, %v1029_v60 }
 0x7ba   :  { %1804 = vmatpush3.xpose.msk.msra.mxu0 %vm197_vm2, %v1186_v61  ;;  %1805 = vmatprep.mubr.msk.f32.mxu0 %vm2004_vm1, %v2003_v8 }
 0x7bb   :  { %1813 = vmatprep.subr.mxu0 %v2003_v8 }
 0x7e8   :  { %v1026_v62 = vpop.xlane.xlu0 %1025 }
 0x7e9   :  { %1894 = vrcp.f32 %v1026_v62 }
 0x7ec   :  { %v1184_v0 = vpop.permute.xlu0 %1183 }
 0x7ed   :  { %1806 = vmatmul.mubr.msk.f32.vlgmr.msra.gmra.mrb[10].mxu0 %vm197_vm2, %v1184_v0 }
 0x7ee   :  { %1815 = vmatprep.mubr.msk.f32.mxu0 %vm2004_vm1, %v2003_v8 }
 0x7f3   :  { %v1895_v2 = vpop.eup %1894 }
 0x7f4   :  { %v1030_v4 = vmul.f32 %v1895_v2, %v1891_v55 }
 0x7f6   :  { %1801 = vmatmul.mubr.msk.f32.vlgmr.msra.gmra.mrb[14].mxu1 %vm197_vm2, %v1030_v4 }
 0x7f7   :  { %1809 = vmatpush3.xpose.msk.msra.mxu1 %vm197_vm2, %v1264_v3  ;;  %1810 = vmatprep.mubr.msk.f32.mxu1 %vm2004_vm1, %v2003_v8 }
 0x7f8   :  { %1818 = vmatprep.subr.mxu1 %v2003_v8 }
 0x7fa   :  { %1811 = vmatmul.mubr.msk.f32.vlgmr.msra.gmra.mrb[16].mxu1 %vm197_vm2, %v1262_v5 }
 0x7fb   :  { %1820 = vmatprep.mubr.msk.f32.mxu1 %vm2004_vm1, %v2003_v8 }
 0x88c   :  { %v1103_v6 = vpop.f32.mrb[8].mxu0 }
 0x88d   :  { %v1797_v7 = vpop.f32.mrb[9].mxu0 }
 0x8c0   :  { %v1257_v9 = vpop.f32.mrb[10].mxu0 }
 0x8c1   :  { %v1258_v10 = vadd.f32 %v1257_v9, %v2139_v26  ;;  %v1807_v11 = vpop.f32.mrb[11].mxu0 }
 0x8c3   :  { %v1339_v14 = vsel %vm197_vm2, %v1258_v10, -inf }
 0x8c4   :  { %1340 = vmax.xlane.f32.xlu0 %v1339_v14 }
 0x8c9   :  { %v1179_v15 = vpop.f32.mrb[14].mxu1 }
 0x8ca   :  { %v1802_v16 = vpop.f32.mrb[15].mxu1 }
 0x8cd   :  { %v1335_v17 = vpop.f32.mrb[16].mxu1 }
 0x8ce   :  { %v1336_v18 = vadd.f32 %v1335_v17, %v2142_v31  ;;  %v1812_v19 = vpop.f32.mrb[17].mxu1 }
 0x8d0   :  { %v1342_v20 = vsel %vm197_vm2, %v1336_v18, -inf }
 0x8d1   :  { %1343 = vmax.xlane.f32.xlu1 %v1342_v20 }
 0x8e2   :  { %1361 = vrot.lane.b32.xlu1 %v2118_v12, %s2016_s21 }
 0x8e6   :  { %1515 = vrot.lane.b32.xlu1 %v2207_v34, %s2001_s10 }
 0x8ea   :  { %1517 = vrot.lane.b32.xlu1 %v2211_v40, %s2001_s10  ;;  %v1842_v40 = vpack.c.bf16 %v1546_v38, %v1545_v37 }
 0x8ee   :  { %1525 = vrot.lane.b32.xlu1 %v1179_v15, %s2017_s22 }
 0x951   :  { %v1341_v8 = vpop.xlane.xlu0 %1340 }
 0x952   :  { %v1345_v26 = vsub.f32 %v1258_v10, %v1341_v8 }
 0x954   :  { %v1347_v21 = vmul.f32 1.442695, %v1345_v26 }
 0x956   :  { %1896 = vpow2.f32 %v1347_v21 }
 0x95e   :  { %v1344_v31 = vpop.xlane.xlu1 %1343 }
 0x95f   :  { %v1346_v22 = vsub.f32 %v1336_v18, %v1344_v31 }
 0x960   :  { %v1897_v23 = vpop.eup %1896 }
 0x961   :  { %v1349_v24 = vmul.f32 1.442695, %v1346_v22  ;;  %v1351_v25 = vsel %vm197_vm2, %v1897_v23, 0.0 }
 0x962   :  { %v1362_v27 = vpop.permute.xlu1 %1361  ;;  %1352 = vadd.xlane.f32.xlu0 %v1351_v25 }
 0x963   :  { %1898 = vpow2.f32 %v1349_v24  ;;  %1814 = vmatpush3.msra.mxu0 %v1362_v27 }
 0x964   :  { %1843 = vmatprep.subr.bf16.mxu0 %v1842_v40 }
 0x966   :  { %v1516_v46 = vpop.permute.xlu1 %1515 }
 0x967   :  { %v1537_v48 = vsel %vm197_vm2, %v2175_v63, %v1516_v46  ;;  %v1685_v63 = vld [vmem:[%s2286_s5] ss:$0 sm:$0xff] }
 0x96a   :  { %v1518_v52 = vpop.permute.xlu1 %1517 }
 0x96b   :  { %v1538_v54 = vsel %vm197_vm2, %v2177_v1, %v1518_v52 }
 0x96d   :  { %v1899_v12 = vpop.eup %1898 }
 0x96e   :  { %v1354_v28 = vsel %vm197_vm2, %v1899_v12, 0.0  ;;  %v1526_v53 = vpop.permute.xlu1 %1525 }
 0x96f   :  { %1355 = vadd.xlane.f32.xlu0 %v1354_v28  ;;  %v1541_v55 = vsel %vm1539_vm4, %v1538_v54, %v1526_v53 }
 0x985   :  { %1437 = vrot.lane.b32.xlu0 %v2121_v13, %s2016_s21  ;;  %v1548_v13 = vld [vmem:[#allocation7 + $0x18] sm:$0xff] }
 0x986   :  { %v1846_v41 = vpack.c.bf16 %v1548_v13, %v1547_v39 }
 0x989   :  { %1523 = vrot.lane.b32.xlu0 %v1103_v6, %s2017_s22 }
 0x9ef   :  { %v1353_v29 = vpop.xlane.xlu0 %1352 }
 0x9f0   :  { %1900 = vrcp.f32 %v1353_v29 }
 0x9fa   :  { %v1901_v30 = vpop.eup %1900 }
 0x9fb   :  { %v1359_v32 = vmul.f32 %v1901_v30, %v1897_v23 }
 0x9fc   :  { %v1356_v33 = vpop.xlane.xlu0 %1355 }
 0x9fd   :  { %1902 = vrcp.f32 %v1356_v33  ;;  %1816 = vmatmul.mubr.msk.f32.vlgmr.msra.gmra.mrb[12].mxu0 %vm197_vm2, %v1359_v32 }
 0x9fe   :  { %1845 = vmatpush3.bf16.msra.mxu0 %v1842_v40 }
 0x9ff   :  { %1847 = vmatprep.subr.bf16.mxu0 %v1846_v41 }
 0xa00   :  { %v1438_v34 = vpop.permute.xlu0 %1437 }
 0xa01   :  { %1819 = vmatpush3.msra.mxu1 %v1438_v34 }
 0xa02   :  { %1849 = vmatpush3.bf16.msra.mxu0 %v1846_v41 }
 0xa04   :  { %v1524_v47 = vpop.permute.xlu0 %1523 }
 0xa05   :  { %v1540_v49 = vsel %vm1539_vm4, %v1537_v48, %v1524_v47 }
 0xa07   :  { %v1903_v35 = vpop.eup %1902 }
 0xa08   :  { %v1360_v36 = vmul.f32 %v1903_v35, %v1899_v12 }
 0xa0a   :  { %1821 = vmatmul.mubr.msk.f32.vlgmr.msra.gmra.mrb[18].mxu1 %vm197_vm2, %v1360_v36 }
 0xad0   :  { %v1433_v42 = vpop.f32.mrb[12].mxu0 }
 0xad1   :  { %1531 = vrot.lane.b32.xlu0 %v1433_v42, %s2018_s23  ;;  %v1817_v43 = vpop.f32.mrb[13].mxu0 }
 0xadd   :  { %v1509_v44 = vpop.f32.mrb[18].mxu1 }
 0xade   :  { %1533 = vrot.lane.b32.xlu1 %v1509_v44, %s2018_s23  ;;  %v1822_v45 = vpop.f32.mrb[19].mxu1 }
 0xb43   :  { %v1532_v50 = vpop.permute.xlu0 %1531 }
 0xb44   :  { %v1543_v51 = vsel %vm1542_vm3, %v1540_v49, %v1532_v50 }
 0xb45   :  { %1831 = vmatprep.mubr.msk.f32.mxu0 %vm78_vm0, %v1543_v51 }
 0xb50   :  { %v1534_v56 = vpop.permute.xlu1 %1533 }
 0xb51   :  { %v1544_v57 = vsel %vm1542_vm3, %v1541_v55, %v1534_v56 }
 0xb52   :  { %1832 = vmatmul.mubr.msk.f32.vlgmr.msra.gmra.mrb[14].mxu0 %vm78_vm0, %v1544_v57 }
 0xc25   :  { %v1833_v58 = vpop.f32.mrb[14].mxu0 }
 0xc26   :  { %v1634_v59 = vadd.f32 %v1833_v58, %v1685_v63  ;;  %v1628_v60 = vpop.f32.mrb[15].mxu0 }
 0xc27   :  { %v1629_v61 = vadd.f32 %v1685_v63, %v1628_v60 }
 0xc28   :  { %1638 = vst.msk [vmem:[#allocation8 + $0x8] sm:$0xff] %vm78_vm0, %v1634_v59 }
 0xc29   :  { %1637 = vst.msk [vmem:[#allocation8] sm:$0xff] %vm78_vm0, %v1629_v61 }
 0xc2a   :  { %1981 = shalt.err (!%p1978_p0)
}
 0xc2b   :  { %s1982_s7 = scalar_lea.hbm %s2287_s6, 256 }
 0xc2c   :  { %p1983_p1 = scmp.ne.s32.totalorder %s2287_s6, %s1982_s7  ;;  %p1986_p2 = scmp.lt.u32.totalorder %s1982_s7, %s2287_s6 }
 0xc2e   :  { %p1988_p3 = pnand %p1986_p2, %p1983_p1 }
 0xc30   :  { %1991 = shalt.err (!%p1988_p3)
}
 0xc31   :  { %1650 = dma.vmem_to_hbm [thread:$0]  %s1645_s28, 256, %s2287_s6, [#allocation4], %s2000_s9, %s2000_s9, %s2001_s10  }
 0xc32   :  { %1996 = dma.done.wait [#allocation4], 256  }
 0xc33   :  { %1997 = vsyncadd [#allocation4], 4294967040 }
 0xc34   :  { %1654 = vsyncpa [#allocation3], 1 }
 0xc35   :  { %1655 = vsyncpa [#allocation6], 1 }
 0xc36   :  { %1656 = vsyncpa [#allocation4], 1 }

</bundles_post_ra>
